<compile_context>
chip_gen: v6e
topology: v6e:2x2x1
jax: 0.10.0
libtpu: 0.0.40
codegen_flags: <defaults>
</compile_context>

<pallas_src>
import jax
import jax.numpy as jnp
from jax.experimental import pallas as pl
from jax.experimental.pallas import tpu as pltpu

# ---------------- problem sizes (small, TPU-tile friendly) ----------------
B = 16            # number of raw indices (bags)
F = 16            # fanout per raw index (<= 20 cap in fetch_key_index)
N = B * F         # total fanned-out rows = 256
N_CAT_COLS = 3    # categorical columns
EMB_DIM = 8       # embedding dim per categorical column
N_NUM = 8         # numeric feature columns
D = N_CAT_COLS * EMB_DIM + N_NUM   # 32  (output_dims before Linear)
HIDDEN = 32       # output_layer size
VOCAB = 50
N_ROWS = 100      # rows in the underlying table
N_ROWS_PAD = 128  # table rows padded to a full lane tile

BAGS_PER_BLOCK = 8
ROWS_PER_BLOCK = BAGS_PER_BLOCK * F    # 128 rows (MXU M dim) per grid step


def gnn_node_kernel(idx_ref, tab_ref, w_ref, b_ref, o_ref):
    # idx_ref: (ROWS_PER_BLOCK, 1)      int32  fanned-out row indices (block)
    # tab_ref: (N_ROWS_PAD, D)          bf16   per-table-row [cat-emb | num]
    # w_ref:   (D, HIDDEN)              bf16   output_layer weight^T, BN folded
    # b_ref:   (1, HIDDEN)              f32    output_layer bias, BN folded
    # o_ref:   (BAGS_PER_BLOCK, HIDDEN) f32
    idx = idx_ref[...]                                           # (128, 1)
    lanes = jax.lax.broadcasted_iota(
        jnp.int32, (ROWS_PER_BLOCK, N_ROWS_PAD), 1)
    # Fused row gather: one-hot over the (VMEM-resident) table rows, contracted
    # on the MXU.  Padded table rows (>= N_ROWS) are never selected.
    onehot = jnp.where(lanes == idx, 1.0, 0.0).astype(jnp.bfloat16)
    x = jnp.dot(onehot, tab_ref[...],
                preferred_element_type=jnp.float32)              # (128, D)
    # Linear(D, HIDDEN) + ReLU: bf16 MXU inputs, f32 accumulation + elementwise.
    h = jnp.dot(x.astype(jnp.bfloat16), w_ref[...],
                preferred_element_type=jnp.float32)              # (128, H)
    h = jnp.maximum(h + b_ref[...], 0.0)
    # embedding_bag(mode='mean') over contiguous fixed-F bags:
    # reshape + sublane reduction, no materialized aggregation matrix.
    bags = h.reshape(BAGS_PER_BLOCK, F, HIDDEN)
    o_ref[...] = jnp.sum(bags, axis=1) * jnp.float32(1.0 / F)


def gnn_node_forward(row_idx, table_feat_bf16, w_fold_bf16, b_fold):
    # 1-D parallel grid over bag blocks: each step is independent (bags are
    # contiguous), so v7x's two TensorCores can split the grid and the usual
    # double-buffered pipeline applies.  Per-step VMEM footprint is ~50 KiB,
    # far under every generation's scoped limit.
    return pl.pallas_call(
        gnn_node_kernel,
        out_shape=jax.ShapeDtypeStruct((B, HIDDEN), jnp.float32),
        grid=(B // BAGS_PER_BLOCK,),
        in_specs=[
            pl.BlockSpec((ROWS_PER_BLOCK, 1), lambda i: (i, 0)),   # row_idx
            pl.BlockSpec((N_ROWS_PAD, D), lambda i: (0, 0)),       # table_feat
            pl.BlockSpec((D, HIDDEN), lambda i: (0, 0)),           # w_fold
            pl.BlockSpec((1, HIDDEN), lambda i: (0, 0)),           # b_fold
        ],
        out_specs=pl.BlockSpec((BAGS_PER_BLOCK, HIDDEN), lambda i: (i, 0)),
        compiler_params=pltpu.CompilerParams(
            dimension_semantics=("parallel",)),
    )(row_idx, table_feat_bf16, w_fold_bf16, b_fold)


if __name__ == "__main__":
    key = jax.random.PRNGKey(0)
    ks = jax.random.split(key, 12)

    # ---- synthetic table + parameters (deterministic) ----
    cat_feat = jax.random.randint(ks[0], (N_ROWS, N_CAT_COLS), 0, VOCAB)
    num_feat = jax.random.normal(ks[1], (N_ROWS, N_NUM), dtype=jnp.float32)

    emb_tables = [
        0.1 * jax.random.normal(ks[2 + i], (VOCAB, EMB_DIM), dtype=jnp.float32)
        for i in range(N_CAT_COLS)
    ]

    # BatchNorm1d (eval mode: running statistics)
    bn_gamma = 1.0 + 0.1 * jax.random.normal(ks[5], (N_NUM,), dtype=jnp.float32)
    bn_beta = 0.1 * jax.random.normal(ks[6], (N_NUM,), dtype=jnp.float32)
    bn_mean = 0.1 * jax.random.normal(ks[7], (N_NUM,), dtype=jnp.float32)
    bn_var = jnp.abs(1.0 + 0.1 * jax.random.normal(ks[8], (N_NUM,), dtype=jnp.float32))
    bn_eps = 1e-5

    # output_layer: Linear(D, 32), xavier-normal-style weight init
    xavier_std = (2.0 / (D + HIDDEN)) ** 0.5
    w = xavier_std * jax.random.normal(ks[9], (HIDDEN, D), dtype=jnp.float32)
    b = 0.01 * jax.random.normal(ks[10], (HIDDEN,), dtype=jnp.float32)

    # fetch_key_index fanout result (key_index.index): N row indices, F per bag
    row_idx = jax.random.randint(ks[11], (N, 1), 0, N_ROWS)        # int32

    # ---- table-only constant folds (done once, independent of the batch) ----
    # Per-table-row concatenated features: [emb_0 | emb_1 | emb_2 | numeric].
    cat_emb_rows = jnp.concatenate(
        [emb_tables[i][cat_feat[:, i]] for i in range(N_CAT_COLS)], axis=1)
    table_feat = jnp.concatenate([cat_emb_rows, num_feat], axis=1)  # (N_ROWS, D)
    table_feat_pad = jnp.zeros((N_ROWS_PAD, D), jnp.float32).at[:N_ROWS].set(table_feat)
    table_feat_bf16 = table_feat_pad.astype(jnp.bfloat16)

    # BN (eval) affine acts on numeric columns only; fold into Linear:
    #   (x * s + t) @ W^T + b == x @ (s[:, None] * W^T) + (t @ W^T + b)
    bn_scale = bn_gamma / jnp.sqrt(bn_var + bn_eps)
    scale = jnp.concatenate(
        [jnp.ones((N_CAT_COLS * EMB_DIM,), jnp.float32), bn_scale])            # (D,)
    shift = jnp.concatenate(
        [jnp.zeros((N_CAT_COLS * EMB_DIM,), jnp.float32),
         bn_beta - bn_mean * bn_scale])                                         # (D,)
    w_t = w.T                                                      # (D, HIDDEN)
    w_fold = scale[:, None] * w_t                                  # (D, HIDDEN)
    b_fold = (shift @ w_t + b)[None, :].astype(jnp.float32)        # (1, HIDDEN)
    w_fold_bf16 = w_fold.astype(jnp.bfloat16)

    # ---- run kernel ----
    out = gnn_node_forward(row_idx, table_feat_bf16, w_fold_bf16, b_fold)
    out = jax.block_until_ready(out)
    assert out.shape == (B, HIDDEN)

    # ---- references ----
    ridx = row_idx[:, 0]

    # (a) same bf16-quantized parameters, plain f32 XLA math -> tight tolerance
    x_bf = table_feat_bf16.astype(jnp.float32)[ridx]               # (N, D)
    h_bf = jnp.maximum(x_bf @ w_fold_bf16.astype(jnp.float32) + b_fold, 0.0)
    ref_bf = h_bf.reshape(B, F, HIDDEN).mean(axis=1)
    assert jnp.allclose(out, ref_bf, atol=1e-4, rtol=1e-4)

    # (b) full-f32 unfolded module math (BN -> Linear -> ReLU -> embbag mean)
    x_f32 = table_feat[ridx]                                       # (N, D)
    xn = x_f32 * scale[None, :] + shift[None, :]                   # BN (eval)
    h32 = jnp.maximum(xn @ w_t + b[None, :], 0.0)                  # Linear+ReLU
    ref32 = h32.reshape(B, F, HIDDEN).mean(axis=1)                 # embbag mean
    assert jnp.allclose(out, ref32, atol=1e-2, rtol=1e-2)

    print("KERNEL_OK")
</pallas_src>

<mosaic_0001>
module attributes {stable_mosaic.version = 11 : i64} {
  func.func @gnn_node_kernel(%arg0: i32, %arg1: memref<128x1xi32, #tpu.memory_space<vmem>>, %arg2: memref<128x32xbf16, #tpu.memory_space<vmem>>, %arg3: memref<32x32xbf16, #tpu.memory_space<vmem>>, %arg4: memref<1x32xf32, #tpu.memory_space<vmem>>, %arg5: memref<8x32xf32, #tpu.memory_space<vmem>>) attributes {dimension_semantics = [#tpu.dimension_semantics<parallel>], iteration_bounds = array<i64: 2>, scalar_prefetch = 0 : i64, scratch_operands = 0 : i64, tpu.core_type = #tpu.core_type<tc>, window_params = [{transform_indices = @transform_0, window_bounds = array<i64: 128, 1>}, {pipeline_mode = #tpu.pipeline_mode<synchronous>, transform_indices = @transform_1, window_bounds = array<i64: 128, 32>}, {pipeline_mode = #tpu.pipeline_mode<synchronous>, transform_indices = @transform_2, window_bounds = array<i64: 32, 32>}, {pipeline_mode = #tpu.pipeline_mode<synchronous>, transform_indices = @transform_3, window_bounds = array<i64: 1, 32>}, {transform_indices = @transform_4, window_bounds = array<i64: 8, 32>}]} {
    %c0 = arith.constant 0 : index
    %c0_0 = arith.constant 0 : index
    %0 = vector.load %arg1[%c0, %c0_0] : memref<128x1xi32, #tpu.memory_space<vmem>>, vector<128x1xi32>
    %1 = tpu.iota {dimensions = array<i32: 1>} : vector<128x128xi32>
    %2 = vector.broadcast %0 : vector<128x1xi32> to vector<128x128xi32>
    %3 = arith.cmpi eq, %1, %2 : vector<128x128xi32>
    %cst = arith.constant 1.000000e+00 : f32
    %cst_1 = arith.constant 0.000000e+00 : f32
    %4 = vector.broadcast %cst : f32 to vector<128x128xf32>
    %5 = vector.broadcast %cst_1 : f32 to vector<128x128xf32>
    %6 = arith.select %3, %4, %5 : vector<128x128xi1>, vector<128x128xf32>
    %7 = arith.truncf %6 : vector<128x128xf32> to vector<128x128xbf16>
    %c0_2 = arith.constant 0 : index
    %c0_3 = arith.constant 0 : index
    %8 = vector.load %arg2[%c0_2, %c0_3] : memref<128x32xbf16, #tpu.memory_space<vmem>>, vector<128x32xbf16>
    %cst_4 = arith.constant dense<0.000000e+00> : vector<128x32xf32>
    %9 = tpu.matmul %7, %8, %cst_4 {dimension_numbers = #tpu.dot_dimension_numbers<[1], [0], [0], [1], [0, 0, 1, 1], [], []>} : vector<128x128xbf16>, vector<128x32xbf16>, vector<128x32xf32> -> vector<128x32xf32>
    %10 = arith.truncf %9 : vector<128x32xf32> to vector<128x32xbf16>
    %c0_5 = arith.constant 0 : index
    %c0_6 = arith.constant 0 : index
    %11 = vector.load %arg3[%c0_5, %c0_6] : memref<32x32xbf16, #tpu.memory_space<vmem>>, vector<32x32xbf16>
    %cst_7 = arith.constant dense<0.000000e+00> : vector<128x32xf32>
    %12 = tpu.matmul %10, %11, %cst_7 {dimension_numbers = #tpu.dot_dimension_numbers<[1], [0], [0], [1], [0, 0, 1, 1], [], []>} : vector<128x32xbf16>, vector<32x32xbf16>, vector<128x32xf32> -> vector<128x32xf32>
    %c0_8 = arith.constant 0 : index
    %c0_9 = arith.constant 0 : index
    %13 = vector.load %arg4[%c0_8, %c0_9] : memref<1x32xf32, #tpu.memory_space<vmem>>, vector<1x32xf32>
    %14 = vector.broadcast %13 : vector<1x32xf32> to vector<128x32xf32>
    %15 = arith.addf %12, %14 : vector<128x32xf32>
    %cst_10 = arith.constant 0.000000e+00 : f32
    %16 = vector.broadcast %cst_10 : f32 to vector<128x32xf32>
    %17 = arith.maximumf %15, %16 : vector<128x32xf32>
    %18 = vector.shape_cast %17 : vector<128x32xf32> to vector<8x16x32xf32>
    %cst_11 = arith.constant dense<0.000000e+00> : vector<8x32xf32>
    %19 = vector.multi_reduction <add>, %18, %cst_11 [1] : vector<8x16x32xf32> to vector<8x32xf32>
    %cst_12 = arith.constant 6.250000e-02 : f32
    %20 = vector.broadcast %cst_12 : f32 to vector<8x32xf32>
    %21 = arith.mulf %19, %20 : vector<8x32xf32>
    %c0_13 = arith.constant 0 : index
    %c0_14 = arith.constant 0 : index
    %22 = vector.load %arg5[%c0_13, %c0_14] : memref<8x32xf32, #tpu.memory_space<vmem>>, vector<8x32xf32>
    tpu.vector_store %arg5[%c0_13, %c0_14], %21 {strides = array<i32>} : memref<8x32xf32, #tpu.memory_space<vmem>>, vector<8x32xf32>,
    return
  }
  func.func @transform_0(%arg0: i32) -> (i32, i32) {
    %c0_i32 = arith.constant 0 : i32
    %c0_i32_0 = arith.constant 0 : i32
    return %arg0, %c0_i32 : i32, i32
  }
  func.func @transform_1(%arg0: i32) -> (i32, i32) {
    %c0_i32 = arith.constant 0 : i32
    %c0_i32_0 = arith.constant 0 : i32
    %c0_i32_1 = arith.constant 0 : i32
    return %c0_i32, %c0_i32_0 : i32, i32
  }
  func.func @transform_2(%arg0: i32) -> (i32, i32) {
    %c0_i32 = arith.constant 0 : i32
    %c0_i32_0 = arith.constant 0 : i32
    %c0_i32_1 = arith.constant 0 : i32
    return %c0_i32, %c0_i32_0 : i32, i32
  }
  func.func @transform_3(%arg0: i32) -> (i32, i32) {
    %c0_i32 = arith.constant 0 : i32
    %c0_i32_0 = arith.constant 0 : i32
    %c0_i32_1 = arith.constant 0 : i32
    return %c0_i32, %c0_i32_0 : i32, i32
  }
  func.func @transform_4(%arg0: i32) -> (i32, i32) {
    %c0_i32 = arith.constant 0 : i32
    %c0_i32_0 = arith.constant 0 : i32
    return %arg0, %c0_i32 : i32, i32
  }
}

</mosaic_0001>

<bundles_post_ra>
// kernel: tpu_custom_call.1
= control target key start
LH: loop header
LB: loop body
LE: loop exit
PB: predicated region body
PF: predicated region fallthrough
CT: control target
= control target key end

     0   :  { %9 = vsyncpa [#allocation3], 0  ;;  %s1269_s0 = inlined_call_operand.vmem [shape: s32[256,1], index: 0, kind: input, shape index: {}]   ;;  %s1270_s1 = inlined_call_operand.vmem [shape: bf16[128,32], index: 1, kind: input, shape index: {}]   ;;  %s1271_s2 = inlined_call_operand.vmem [shape: bf16[32,32], index: 2, kind: input, shape index: {}]   ;;  %s1272_s3 = inlined_call_operand.vmem [shape: f32[1,32], index: 3, kind: input, shape index: {}]   ;;  %s1273_s4 = inlined_call_operand.hbm [shape: f32[16,32], index: 4, kind: output, shape index: {}]  }
   0x1   :  { %11 = vsyncpa [#allocation3 + $0x1], 0  ;;  %s1079_s15 = smov 0   ;;  %s1081_s16 = smov 0  }
   0x2   :  { %s1083_s17 = smov 0   ;;  %s1085_s18 = smov 0  }
   0x3 LB: > { %s1100_s19 = sadd.s32 4294967295, %s1049_s18   ;;  %s812_s20 = sadd.s32 4294967294, %s1049_s18   ;;  %s1049_s18 = sphi %s1085_s18, %s1279_s18   ;;  %s1045_s17 = sphi %s1083_s17, %s1278_s17   ;;  %s1041_s16 = sphi %s1081_s16, %s1277_s16   ;;  %s1037_s15 = sphi %s1079_s15, %s1276_s15  }
   0x4   : > { %s1104_s21 = sadd.s32 1, %s1049_s18   ;;  %s113_s22 = sadd.s32 1, %s1045_s17 }
   0x5   : > { %s110_s23 = ssub.s32 %s1049_s18, %s1104_s21  ;;  %p123_p0 = scmp.ne.s32.totalorder %s1045_s17, %s1041_s16 }
   0x6   : > { %p111_p1 = scmp.eq.s32.totalorder %s110_s23, 0  ;;  %p124_p2 = scmp.eq.s32.totalorder %s1100_s19, 1 }
   0x7   : > { %p129_p3 = scmp.ne.s32.totalorder %s1041_s16, %s1037_s15  ;;  %p130_p4 = scmp.eq.s32.totalorder %s812_s20, 1 }
   0x8   : > { %s1115_s24 = scalar_select %p111_p1, %s1045_s17, %s113_s22  }
   0x9   : > { %p1117_p5 = por %p124_p2, %p123_p0  ;;  %p1121_p6 = por %p130_p4, %p129_p3 }
   0xa   : > { %p815_p7 = scmp.ge.s32.totalorder %s1049_s18, 1  ;;  %p166_p8 = scmp.lt.s32.totalorder %s1049_s18, 3 }
   0xc   : > { %p167_p9 = pnand %p815_p7, %p166_p8 }
   0xd   : > { %s817_s27 = sshll.u32 (!%p167_p9), %s1100_s19, 4  ;;  %s189_s11 = sand.u32 (!%p167_p9), 1, %s1041_s16  }
   0xe   : > { %170 = sbr.rel (%p167_p9) target bundleno = 616 (0x268), region = 36  ;;  %p193_p10 = scmp.lt.s32.totalorder (!%p167_p9), %s817_s27, 31 }
   0xf   : > { %s816_s12 = sshll.u32 (!%p167_p9), %s189_s11, 3  ;;  %s855_s13 = sshll.u32 (!%p167_p9), %s1100_s19, 7 }
  0x10   : > { %s191_s14 = scalar_lea.vmem (!%p167_p9), [#allocation2], %s816_s12  ;;  %s740_s28 = scalar_lea.sflag (!%p167_p9), [#allocation3], %s189_s11 }
  0x11   : > { %s753_s20 = sshll.u32 (!%p167_p9), %s191_s14, 4  ;;  %s1053_s19 = smov (!%p167_p9), [#allocation2]   ;;  %s754_s20 = int_to_ptr.vmem [resolvable:$true] %s753_s20 }
  0x12   : > { %s989_s29 = scalar_lea.vmem (!%p167_p9), %s754_s20, 128  ;;  %s993_s30 = sshll.u32 (!%p167_p9), %s1053_s19, 4  ;;  %s994_s30 = int_to_ptr.vmem [resolvable:$false] %s993_s30 }
  0x13   : > { %v1051_v0 = vmov 0   ;;  %v979_v1 = vld [vmem:[%s1270_s1 + $0x38] sm:$0xff]   ;;  %v980_v2 = vld [vmem:[%s1270_s1 + $0x30] sm:$0xff]   ;;  %s1281_s27 = smov (!%p193_p10, %s817_s27), 31  ;;  %v981_v3 = vld [vmem:[%s1270_s1 + $0x28] sm:$0xff]   ;;  %v215_v25 = vlaneseq  ;;  %p990_p11 = scmp.ne.s32.totalorder %s754_s20, %s989_s29 }
  0x14   : > { %978 = vset.pattern.permute.xlu1 %v1051_v0  ;;  %977 = vset.pattern.permute.xlu0 %v1051_v0  ;;  %s818_s6 = sshll.u32 %s1281_s27, 3  ;;  %v982_v8 = vld [vmem:[%s1270_s1 + $0x20] sm:$0xff]   ;;  %v983_v10 = vld [vmem:[%s1270_s1 + $0x18] sm:$0xff]   ;;  %v984_v14 = vld [vmem:[%s1270_s1 + $0x10] sm:$0xff]   ;;  %v1052_v31 = vmov 1.0|1.0   ;;  %s1231_s27 = scalar_lea.hbm %s1273_s4, %s855_s13 }
  0x15   : > { %884 = vmatprep.subr.bf16.mxu0 %v979_v1  ;;  %s1137_s9 = scalar_lea.vmem %s1269_s0, %s818_s6  ;;  %v985_v17 = vld [vmem:[%s1270_s1 + $0x8] sm:$0xff]   ;;  %v986_v20 = vld [vmem:[%s1270_s1] sm:$0xff]   ;;  %v216_v28 = vand.u32 127, %v215_v25  ;;  %p991_p12 = pnand %p990_p11, %p1117_p5 }
  0x16   : > { %885 = vmatpush3.bf16.msra.mxu0 %v979_v1  ;;  %v201_v4 = vld [vmem:[%s1137_s9 + $0x10] sm:$0xff]  ;;  %v199_v5 = vld [vmem:[%s1137_s9] sm:$0xff]  ;;  %v202_v6 = vld [vmem:[%s1137_s9 + $0x18] sm:$0xff]  ;;  %s995_s5 = scalar_lea.vmem %s994_s30, 256  ;;  %p996_p0 = scmp.lt.s32.totalorder %s754_s20, %s994_s30 }
  0x17   : > { %886 = vmatprep.subr.bf16.mxu0 %v980_v2  ;;  %224 = vperm.xlu1 %978, %v201_v4   ;;  %v200_v7 = vld [vmem:[%s1137_s9 + $0x8] sm:$0xff]  ;;  %v203_v11 = vld [vmem:[%s1137_s9 + $0x20] sm:$0xff]  ;;  %v206_v12 = vld [vmem:[%s1137_s9 + $0x38] sm:$0xff]  ;;  %p992_p13 = pneg %p991_p12  ;;  %p997_p1 = scmp.lt.s32.totalorder %s995_s5, %s989_s29 }
  0x18   : > { %218 = vperm.xlu0 %977, %v199_v5   ;;  %v204_v9 = vld [vmem:[%s1137_s9 + $0x28] sm:$0xff]  ;;  %v205_v13 = vld [vmem:[%s1137_s9 + $0x30] sm:$0xff]  ;;  %v207_v16 = vld [vmem:[%s1137_s9 + $0x40] sm:$0xff] }
  0x19   : > { %v208_v15 = vld [vmem:[%s1137_s9 + $0x48] sm:$0xff]  ;;  %v210_v18 = vld [vmem:[%s1137_s9 + $0x58] sm:$0xff]  ;;  %v209_v19 = vld [vmem:[%s1137_s9 + $0x50] sm:$0xff]  ;;  %p998_p2 = por %p997_p1, %p996_p0 }
  0x1a   : > { %887 = vmatpush3.bf16.msra.mxu0 %v980_v2  ;;  %v212_v21 = vld [vmem:[%s1137_s9 + $0x68] sm:$0xff]  ;;  %v211_v22 = vld [vmem:[%s1137_s9 + $0x60] sm:$0xff]  ;;  %v214_v23 = vld [vmem:[%s1137_s9 + $0x78] sm:$0xff] }
  0x1b   : > { %888 = vmatprep.subr.bf16.mxu0 %v981_v3  ;;  %227 = vperm.xlu1 %978, %v202_v6   ;;  %v213_v24 = vld [vmem:[%s1137_s9 + $0x70] sm:$0xff]  ;;  %v987_v44 = vld [vmem:[%s1271_s2 + $0x8] sm:$0xff]   ;;  %v988_v45 = vld [vmem:[%s1271_s2] sm:$0xff]   ;;  %p999_p3 = pnand %p998_p2, %p992_p13 }
  0x1c   : > { %221 = vperm.xlu0 %977, %v200_v7   ;;  %916 = vmatprep.subr.bf16.mxu1 %v987_v44  ;;  %v1190_v6 = vld [vmem:[%s1272_s3] ss:$0 sm:$0xff] }
  0x1d   : > { %917 = vmatpush3.bf16.msra.mxu1 %v987_v44 }
  0x1e   : > { %889 = vmatpush3.bf16.msra.mxu0 %v981_v3  ;;  %918 = vmatprep.subr.bf16.mxu1 %v988_v45 }
  0x1f   : > { %890 = vmatprep.subr.bf16.mxu0 %v982_v8  ;;  %233 = vperm.xlu1 %978, %v204_v9  }
  0x20   : > { %230 = vperm.xlu0 %977, %v203_v11  }
  0x21   : > { %919 = vmatpush3.bf16.msra.mxu1 %v988_v45 }
  0x22   : > { %891 = vmatpush3.bf16.msra.mxu0 %v982_v8 }
  0x23   : > { %892 = vmatprep.subr.bf16.mxu0 %v983_v10  ;;  %239 = vperm.xlu1 %978, %v206_v12  }
  0x24   : > { %236 = vperm.xlu0 %977, %v205_v13  }
  0x26   : > { %893 = vmatpush3.bf16.msra.mxu0 %v983_v10 }
  0x27   : > { %894 = vmatprep.subr.bf16.mxu0 %v984_v14  ;;  %245 = vperm.xlu1 %978, %v208_v15  }
  0x28   : > { %242 = vperm.xlu0 %977, %v207_v16  }
  0x2a   : > { %895 = vmatpush3.bf16.msra.mxu0 %v984_v14 }
  0x2b   : > { %896 = vmatprep.subr.bf16.mxu0 %v985_v17  ;;  %251 = vperm.xlu1 %978, %v210_v18  }
  0x2c   : > { %248 = vperm.xlu0 %977, %v209_v19  }
  0x2e   : > { %897 = vmatpush3.bf16.msra.mxu0 %v985_v17 }
  0x2f   : > { %898 = vmatprep.subr.bf16.mxu0 %v986_v20  ;;  %257 = vperm.xlu1 %978, %v212_v21  }
  0x30   : > { %254 = vperm.xlu0 %977, %v211_v22  }
  0x32   : > { %899 = vmatpush3.bf16.msra.mxu0 %v986_v20 }
  0x33   : > { %263 = vperm.xlu1 %978, %v214_v23  }
  0x34   : > { %260 = vperm.xlu0 %977, %v213_v24  }
  0x92   : > { %v225_v26 = vpop.permute.xlu1 %224 }
  0x93   : > { %v219_v27 = vpop.permute.xlu0 %218  ;;  %vm267_vm0 = vcmp.eq.s32.totalorder %v216_v28, %v225_v26 }
  0x94   : > { %vm265_vm3 = vcmp.eq.s32.totalorder %v216_v28, %v219_v27 }
  0x96   : > { %v228_v29 = vpop.permute.xlu1 %227 }
  0x97   : > { %v222_v30 = vpop.permute.xlu0 %221  ;;  %vm268_vm1 = vcmp.eq.s32.totalorder %v216_v28, %v228_v29 }
  0x98   : > { %vm266_vm2 = vcmp.eq.s32.totalorder %v216_v28, %v222_v30  ;;  %vm829_vm4 = vmpackc.low %vm268_vm1, %vm267_vm0 }
  0x99   : > { %vm827_vm5 = vmpackc.low %vm266_vm2, %vm265_vm3 }
  0x9a   : > { %900 = vmatprep.mubr.msk.bf16.mxu0 %vm827_vm5, %v1052_v31  ;;  %v234_v32 = vpop.permute.xlu1 %233 }
  0x9b   : > { %v231_v33 = vpop.permute.xlu0 %230  ;;  %vm270_vm6 = vcmp.eq.s32.totalorder %v216_v28, %v234_v32  ;;  %901 = vmatmul.mubr.msk.bf16.vlgmr.msra.gmra.mxu0 %vm829_vm4, %v1052_v31 }
  0x9c   : > { %vm269_vm7 = vcmp.eq.s32.totalorder %v216_v28, %v231_v33 }
  0x9d   : > { %vm831_vm8 = vmpackc.low %vm270_vm6, %vm269_vm7 }
  0x9e   : > { %904 = vmatprep.mubr.msk.bf16.mxu0 %vm831_vm8, %v1052_v31  ;;  %v240_v34 = vpop.permute.xlu1 %239  ;;  %vm497_vm8 = vcmask 261120  }
  0x9f   : > { %v237_v35 = vpop.permute.xlu0 %236  ;;  %vm272_vm9 = vcmp.eq.s32.totalorder %v216_v28, %v240_v34 }
  0xa0   : > { %vm271_vm10 = vcmp.eq.s32.totalorder %v216_v28, %v237_v35 }
  0xa1   : > { %vm833_vm11 = vmpackc.low %vm272_vm9, %vm271_vm10  ;;  %vm723_vm9 = vcmask 1041409   ;;  %vm725_vm10 = vcmask 1042434  }
  0xa2   : > { %v246_v36 = vpop.permute.xlu1 %245 }
  0xa3   : > { %v243_v37 = vpop.permute.xlu0 %242  ;;  %vm274_vm12 = vcmp.eq.s32.totalorder %v216_v28, %v246_v36  ;;  %905 = vmatmul.mubr.msk.bf16.gmra.mxu0 %vm833_vm11, %v1052_v31  ;;  %vm727_vm11 = vcmask 1043459  }
  0xa4   : > { %vm273_vm13 = vcmp.eq.s32.totalorder %v216_v28, %v243_v37 }
  0xa5   : > { %vm835_vm14 = vmpackc.low %vm274_vm12, %vm273_vm13  ;;  %vm729_vm12 = vcmask 1044484   ;;  %vm731_vm13 = vcmask 1045509  }
  0xa6   : > { %908 = vmatprep.mubr.msk.bf16.mxu0 %vm835_vm14, %v1052_v31  ;;  %v252_v38 = vpop.permute.xlu1 %251  ;;  %vm733_vm14 = vcmask 1046534  }
  0xa7   : > { %v249_v39 = vpop.permute.xlu0 %248  ;;  %vm276_vm15 = vcmp.eq.s32.totalorder %v216_v28, %v252_v38 }
  0xa8   : > { %vm275_vm0 = vcmp.eq.s32.totalorder %v216_v28, %v249_v39 }
  0xa9   : > { %vm837_vm1 = vmpackc.low %vm276_vm15, %vm275_vm0  ;;  %vm735_vm15 = vcmask 1047559  }
  0xaa   : > { %v258_v40 = vpop.permute.xlu1 %257 }
  0xab   : > { %v255_v41 = vpop.permute.xlu0 %254  ;;  %vm278_vm2 = vcmp.eq.s32.totalorder %v216_v28, %v258_v40  ;;  %909 = vmatmul.mubr.msk.bf16.gmra.mxu0 %vm837_vm1, %v1052_v31 }
  0xac   : > { %vm277_vm3 = vcmp.eq.s32.totalorder %v216_v28, %v255_v41 }
  0xad   : > { %vm839_vm4 = vmpackc.low %vm278_vm2, %vm277_vm3 }
  0xae   : > { %912 = vmatprep.mubr.msk.bf16.mxu0 %vm839_vm4, %v1052_v31  ;;  %v264_v42 = vpop.permute.xlu1 %263 }
  0xaf   : > { %v261_v43 = vpop.permute.xlu0 %260  ;;  %vm280_vm5 = vcmp.eq.s32.totalorder %v216_v28, %v264_v42 }
  0xb0   : > { %vm279_vm6 = vcmp.eq.s32.totalorder %v216_v28, %v261_v43 }
  0xb1   : > { %vm841_vm7 = vmpackc.low %vm280_vm5, %vm279_vm6 }
  0xb3   : > { %913 = vmatmul.mubr.msk.bf16.gmra.mxu0 %vm841_vm7, %v1052_v31 }
 0x15b   : > { %v902_v46 = vpop.f32.mrf.mxu0 }
 0x15d   : > { %v403_v47 = vpop.f32.mrf.mxu0 }
 0x15f   : > { %v903_v48 = vpop.f32.mrf.mxu0 }
 0x160   : > { %v467_v51 = vpack.c.bf16 %v903_v48, %v902_v46 }
 0x161   : > { %v406_v49 = vpop.f32.mrf.mxu0 }
 0x162   : > { %v466_v50 = vpack.c.bf16 %v406_v49, %v403_v47 }
 0x163   : > { %v906_v52 = vpop.f32.mrf.mxu0 }
 0x164   : > { %920 = vmatprep.mubr.msk.bf16.mxu1 %vm497_vm8, %v466_v50 }
 0x165   : > { %v419_v53 = vpop.f32.mrf.mxu0  ;;  %921 = vmatmul.mubr.msk.bf16.vlgmr.msra.gmra.mxu1 %vm497_vm8, %v467_v51 }
 0x167   : > { %v907_v54 = vpop.f32.mrf.mxu0 }
 0x168   : > { %v469_v57 = vpack.c.bf16 %v907_v54, %v906_v52 }
 0x169   : > { %v422_v55 = vpop.f32.mrf.mxu0 }
 0x16a   : > { %v468_v56 = vpack.c.bf16 %v422_v55, %v419_v53 }
 0x16b   : > { %v910_v58 = vpop.f32.mrf.mxu0 }
 0x16c   : > { %924 = vmatprep.mubr.msk.bf16.mxu1 %vm497_vm8, %v468_v56 }
 0x16d   : > { %v435_v59 = vpop.f32.mrf.mxu0  ;;  %925 = vmatmul.mubr.msk.bf16.gmra.mxu1 %vm497_vm8, %v469_v57 }
 0x16f   : > { %v911_v60 = vpop.f32.mrf.mxu0 }
 0x170   : > { %v471_v63 = vpack.c.bf16 %v911_v60, %v910_v58 }
 0x171   : > { %v438_v61 = vpop.f32.mrf.mxu0 }
 0x172   : > { %v470_v62 = vpack.c.bf16 %v438_v61, %v435_v59 }
 0x173   : > { %v914_v0 = vpop.f32.mrf.mxu0 }
 0x174   : > { %928 = vmatprep.mubr.msk.bf16.mxu1 %vm497_vm8, %v470_v62 }
 0x175   : > { %v451_v1 = vpop.f32.mrf.mxu0  ;;  %929 = vmatmul.mubr.msk.bf16.gmra.mxu1 %vm497_vm8, %v471_v63 }
 0x177   : > { %v915_v2 = vpop.f32.mrf.mxu0 }
 0x178   : > { %v473_v5 = vpack.c.bf16 %v915_v2, %v914_v0 }
 0x179   : > { %v454_v3 = vpop.f32.mrf.mxu0 }
 0x17a   : > { %v472_v4 = vpack.c.bf16 %v454_v3, %v451_v1 }
 0x17c   : > { %932 = vmatprep.mubr.msk.bf16.mxu1 %vm497_vm8, %v472_v4 }
 0x17d   : > { %933 = vmatmul.mubr.msk.bf16.gmra.mxu1 %vm497_vm8, %v473_v5 }
 0x225   : > { %v922_v7 = vpop.f32.mrf.mxu1 }
 0x226   : > { %v565_v8 = vadd.f32 %v922_v7, %v1190_v6 }
 0x227   : > { %v556_v9 = vpop.f32.mrf.mxu1 }
 0x228   : > { %v557_v10 = vadd.f32 %v1190_v6, %v556_v9  ;;  %v621_v13 = vmax.f32 %v565_v8, 0.0 }
 0x229   : > { %v923_v11 = vpop.f32.mrf.mxu1 }
 0x22a   : > { %v568_v12 = vadd.f32 %v923_v11, %v1190_v6  ;;  %v619_v15 = vmax.f32 %v557_v10, 0.0  ;;  %v644_v22 = vsel %vm497_vm8, %v621_v13, 0.0 }
 0x22b   : > { %v559_v14 = vpop.f32.mrf.mxu1 }
 0x22c   : > { %v622_v16 = vmax.f32 %v568_v12, 0.0  ;;  %v560_v17 = vadd.f32 %v1190_v6, %v559_v14  ;;  %v635_v24 = vsel %vm497_vm8, %v619_v15, 0.0 }
 0x22d   : > { %v926_v18 = vpop.f32.mrf.mxu1 }
 0x22e   : > { %v645_v19 = vsel %vm497_vm8, %v622_v16, 0.0  ;;  %v620_v20 = vmax.f32 %v560_v17, 0.0  ;;  %v581_v21 = vadd.f32 %v926_v18, %v1190_v6 }
 0x22f   : > { %v572_v23 = vpop.f32.mrf.mxu1  ;;  %v646_v25 = vadd.f32 %v645_v19, %v644_v22 }
 0x230   : > { %v636_v26 = vsel %vm497_vm8, %v620_v20, 0.0  ;;  %v573_v27 = vadd.f32 %v1190_v6, %v572_v23  ;;  %v625_v30 = vmax.f32 %v581_v21, 0.0 }
 0x231   : > { %v637_v28 = vadd.f32 %v636_v26, %v635_v24  ;;  %v927_v29 = vpop.f32.mrf.mxu1  ;;  %v647_v34 = vrot.slane %v646_v25, 4 }
 0x232   : > { %v584_v31 = vadd.f32 %v927_v29, %v1190_v6  ;;  %v623_v35 = vmax.f32 %v573_v27, 0.0  ;;  %v662_v39 = vsel %vm497_vm8, %v625_v30, 0.0 }
 0x233   : > { %v638_v32 = vrot.slane %v637_v28, 4  ;;  %v575_v33 = vpop.f32.mrf.mxu1  ;;  %v648_v46 = vadd.f32 %v647_v34, %v646_v25 }
 0x234   : > { %v626_v36 = vmax.f32 %v584_v31, 0.0  ;;  %v576_v37 = vadd.f32 %v1190_v6, %v575_v33  ;;  %v653_v47 = vsel %vm497_vm8, %v623_v35, 0.0 }
 0x235   : > { %v930_v38 = vpop.f32.mrf.mxu1  ;;  %v639_v43 = vadd.f32 %v638_v32, %v637_v28  ;;  %v649_v58 = vrot.slane %v648_v46, 2 }
 0x236   : > { %v663_v40 = vsel %vm497_vm8, %v626_v36, 0.0  ;;  %v624_v41 = vmax.f32 %v576_v37, 0.0  ;;  %v597_v42 = vadd.f32 %v930_v38, %v1190_v6 }
 0x237   : > { %v664_v44 = vadd.f32 %v663_v40, %v662_v39  ;;  %v588_v45 = vpop.f32.mrf.mxu1  ;;  %v640_v55 = vrot.slane %v639_v43, 2  ;;  %v650_v10 = vadd.f32 %v649_v58, %v648_v46 }
 0x238   : > { %v654_v48 = vsel %vm497_vm8, %v624_v41, 0.0  ;;  %v589_v49 = vadd.f32 %v1190_v6, %v588_v45  ;;  %v629_v53 = vmax.f32 %v597_v42, 0.0 }
 0x239   : > { %v665_v50 = vrot.slane %v664_v44, 4  ;;  %v655_v51 = vadd.f32 %v654_v48, %v653_v47  ;;  %v931_v52 = vpop.f32.mrf.mxu1  ;;  %v641_v5 = vadd.f32 %v640_v55, %v639_v43  ;;  %v651_v28 = vrot.slane %v650_v10, 1 }
 0x23a   : > { %v600_v54 = vadd.f32 %v931_v52, %v1190_v6  ;;  %v627_v59 = vmax.f32 %v589_v49, 0.0  ;;  %v680_v1 = vsel %vm497_vm8, %v629_v53, 0.0 }
 0x23b   : > { %v656_v56 = vrot.slane %v655_v51, 4  ;;  %v591_v57 = vpop.f32.mrf.mxu1  ;;  %v666_v62 = vadd.f32 %v665_v50, %v664_v44  ;;  %v642_v21 = vrot.slane %v641_v5, 1  ;;  %v652_v43 = vadd.f32 %v651_v28, %v650_v10 }
 0x23c   : > { %v630_v60 = vmax.f32 %v600_v54, 0.0  ;;  %v592_v61 = vadd.f32 %v1190_v6, %v591_v57  ;;  %v671_v11 = vsel %vm497_vm8, %v627_v59, 0.0 }
 0x23d   : > { %v657_v63 = vadd.f32 %v656_v56, %v655_v51  ;;  %v934_v0 = vpop.f32.mrf.mxu1  ;;  %v667_v14 = vrot.slane %v666_v62, 2  ;;  %v643_v37 = vadd.f32 %v642_v21, %v641_v5  ;;  %v708_v54 = vmul.f32 0.0625, %v652_v43 }
 0x23e   : > { %v681_v2 = vsel %vm497_vm8, %v630_v60, 0.0  ;;  %v628_v3 = vmax.f32 %v592_v61, 0.0  ;;  %v613_v4 = vadd.f32 %v934_v0, %v1190_v6 }
 0x23f   : > { %v658_v7 = vrot.slane %v657_v63, 2  ;;  %v682_v8 = vadd.f32 %v681_v2, %v680_v1  ;;  %v604_v9 = vpop.f32.mrf.mxu1  ;;  %v668_v29 = vadd.f32 %v667_v14, %v666_v62  ;;  %v707_v49 = vmul.f32 0.0625, %v643_v37 }
 0x240   : > { %v672_v12 = vsel %vm497_vm8, %v628_v3, 0.0  ;;  %v605_v13 = vadd.f32 %v1190_v6, %v604_v9  ;;  %v633_v17 = vmax.f32 %v613_v4, 0.0 }
 0x241   : > { %v659_v15 = vadd.f32 %v658_v7, %v657_v63  ;;  %v683_v16 = vrot.slane %v682_v8, 4  ;;  %v935_v18 = vpop.f32.mrf.mxu1  ;;  %v673_v19 = vadd.f32 %v672_v12, %v671_v11  ;;  %v669_v44 = vrot.slane %v668_v29, 1 }
 0x242   : > { %v616_v20 = vadd.f32 %v935_v18, %v1190_v6  ;;  %v631_v25 = vmax.f32 %v605_v13, 0.0  ;;  %v698_v31 = vsel %vm497_vm8, %v633_v17, 0.0  ;;  %v724_v60 = vsel %vm723_vm9, %v708_v54, %v707_v49 }
 0x243   : > { %v684_v22 = vadd.f32 %v683_v16, %v682_v8  ;;  %v607_v23 = vpop.f32.mrf.mxu1  ;;  %v674_v24 = vrot.slane %v673_v19, 4  ;;  %v660_v30 = vrot.slane %v659_v15, 1  ;;  %v670_v55 = vadd.f32 %v669_v44, %v668_v29 }
 0x244   : > { %v634_v26 = vmax.f32 %v616_v20, 0.0  ;;  %v608_v27 = vadd.f32 %v1190_v6, %v607_v23  ;;  %v689_v39 = vsel %vm497_vm8, %v631_v25, 0.0 }
 0x245   : > { %v685_v32 = vrot.slane %v684_v22, 2  ;;  %v675_v33 = vadd.f32 %v674_v24, %v673_v19  ;;  %v661_v41 = vadd.f32 %v660_v30, %v659_v15  ;;  %v710_v1 = vmul.f32 0.0625, %v670_v55 }
 0x246   : > { %v699_v34 = vsel %vm497_vm8, %v634_v26, 0.0  ;;  %v632_v35 = vmax.f32 %v608_v27, 0.0 }
 0x247   : > { %v700_v36 = vadd.f32 %v699_v34, %v698_v31  ;;  %v676_v38 = vrot.slane %v675_v33, 2  ;;  %v686_v45 = vadd.f32 %v685_v32, %v684_v22  ;;  %v709_v51 = vmul.f32 0.0625, %v661_v41 }
 0x248   : > { %v690_v40 = vsel %vm497_vm8, %v632_v35, 0.0 }
 0x249   : > { %v701_v6 = vrot.slane %v700_v36, 4  ;;  %v691_v42 = vadd.f32 %v690_v40, %v689_v39  ;;  %v677_v46 = vadd.f32 %v676_v38, %v675_v33  ;;  %v687_v56 = vrot.slane %v686_v45, 1 }
 0x24a   : > { %v726_v61 = vsel %vm725_vm10, %v709_v51, %v724_v60 }
 0x24b   : > { %v702_v47 = vadd.f32 %v701_v6, %v700_v36  ;;  %v692_v48 = vrot.slane %v691_v42, 4  ;;  %v678_v50 = vrot.slane %v677_v46, 1  ;;  %v688_v2 = vadd.f32 %v687_v56, %v686_v45 }
 0x24c   : > { %v728_v5 = vsel %vm727_vm11, %v710_v1, %v726_v61 }
 0x24d   : > { %v703_v52 = vrot.slane %v702_v47, 2  ;;  %v693_v53 = vadd.f32 %v692_v48, %v691_v42  ;;  %v679_v57 = vadd.f32 %v678_v50, %v677_v46  ;;  %v712_v9 = vmul.f32 0.0625, %v688_v2 }
 0x24f   : > { %v704_v58 = vadd.f32 %v703_v52, %v702_v47  ;;  %v694_v59 = vrot.slane %v693_v53, 2  ;;  %v711_v62 = vmul.f32 0.0625, %v679_v57 }
 0x251   : > { %v705_v63 = vrot.slane %v704_v58, 1  ;;  %v695_v0 = vadd.f32 %v694_v59, %v693_v53  ;;  %v730_v8 = vsel %vm729_vm12, %v711_v62, %v728_v5 }
 0x252   : > { %v732_v12 = vsel %vm731_vm13, %v712_v9, %v730_v8 }
 0x253   : > { %v696_v3 = vrot.slane %v695_v0, 1  ;;  %v706_v4 = vadd.f32 %v705_v63, %v704_v58 }
 0x255   : > { %v697_v7 = vadd.f32 %v696_v3, %v695_v0  ;;  %v714_v11 = vmul.f32 0.0625, %v706_v4 }
 0x257   : > { %v713_v10 = vmul.f32 0.0625, %v697_v7 }
 0x259   : > { %v734_v13 = vsel %vm733_vm14, %v713_v10, %v732_v12 }
 0x25a   : > { %v736_v14 = vsel %vm735_vm15, %v714_v11, %v734_v13 }
 0x25b   : > { %738 = vst.msk [vmem:[%s191_s14] sm:$0xff] %vm497_vm8, %v736_v14 }
 0x25c   : > { %1002 = shalt.err (!%p999_p3)
}
 0x25d   : > { %s1003_s6 = scalar_lea.hbm %s1231_s27, 128  ;;  %s1007_s9 = scalar_lea.hbm %s1273_s4, 256 }
 0x25e   : > { %p1004_p4 = scmp.ne.s32.totalorder %s1231_s27, %s1003_s6  ;;  %p1008_p9 = scmp.lt.s32.totalorder %s1231_s27, %s1273_s4 }
 0x25f   : > { %p1009_p10 = scmp.lt.s32.totalorder %s1007_s9, %s1003_s6 }
 0x260   : > { %p1005_p7 = pnand %p1004_p4, %p1117_p5 }
 0x261   : > { %p1010_p11 = por %p1009_p10, %p1008_p9 }
 0x262   : > { %p1006_p8 = pneg %p1005_p7 }
 0x264   : > { %p1011_p12 = pnand %p1010_p11, %p1006_p8 }
 0x266   : > { %1014 = shalt.err (!%p1011_p12)
}
 0x267   : > { %936 = dma.vmem_to_hbm [thread:$0]  (%p1117_p5), %s754_s20, 128, %s1231_s27, %s740_s28  }
 0x268 PF: > { %p942_p13 = scmp.ge.s32.totalorder %s1049_s18, 2  ;;  %s765_s12 = sand.u32 1, %s1037_s15  }
 0x269   : > { %s766_s13 = scalar_lea.sflag [#allocation3], %s765_s12 }
 0x26a   : > { %p939_p0 = pnand %p942_p13, %p1121_p6 }
 0x26c   : > { %p940_p1 = pneg %p939_p0 }
 0x26e   : > { %1032 = dma.done.wait (%p940_p1), %s766_s13, 128  }
 0x26f   : > { %1034 = vsyncadd (%p940_p1), %s766_s13, 4294967168  ;;  %p14_p2 = scmp.ge.s32.totalorder %s1104_s21, 4   ;;  %s1276_s15 = smov %s1041_s16 }
 0x270   : > { %s1277_s16 = smov %s1045_s17  ;;  %s1278_s17 = smov %s1115_s24 }
 0x271   : > { %s1279_s18 = smov %s1104_s21  ;;  %16 = sbr.rel (!%p14_p2) target bundleno = 3 (0x3), region = 71 }
 0x276   :  { %771 = vsyncpa [#allocation3], 1 }
 0x277   :  { %773 = vsyncpa [#allocation3 + $0x1], 1 }

</bundles_post_ra>
